<compile_context>
chip_gen: v7x
topology: tpu7x:2x2x1
jax: 0.10.0
libtpu: 0.0.40
codegen_flags: <defaults>
</compile_context>

<pallas_src>
import functools

import jax
import jax.numpy as jnp
from jax import lax
from jax.experimental import pallas as pl
from jax.experimental.pallas import tpu as pltpu


# ----------------------------- Pallas kernel -----------------------------

def _make_conv_relu_kernel(taps, c_out, Hh, Wh, Lk):
    """Builds the fused conv(tap-accumulation) + bias + ReLU kernel.

    taps : static tuple of (dz, dy, dx) kernel offsets.
    Hh/Wh: half-resolution (parity-split) padded H/W extents.
    Lk   : flattened output-spatial length written per grid step.
    """
    HW = Hh * Wh

    def kernel(x_ref, w_ref, b_ref, o_ref):
        # x_ref : (1, 2, 2, C_in, L)  bf16  parity-split padded input (one batch)
        # w_ref : (T, C_out, C_in)    bf16  per-tap weight matrices
        # b_ref : (C_out, 1)          f32   bias
        # o_ref : (1, C_out, Lk)      f32   channel-first output, flat spatial
        planes = [[x_ref[0, 0, 0], x_ref[0, 0, 1]],
                  [x_ref[0, 1, 0], x_ref[0, 1, 1]]]          # each (C_in, L)

        acc = jnp.zeros((c_out, Lk), dtype=jnp.float32)
        for t, (dz, dy, dx) in enumerate(taps):              # static unrolled loop
            py, oy = dy % 2, dy // 2
            px, ox = dx % 2, dx // 2
            s = dz * HW + oy * Wh + ox                       # static lane offset
            slab = planes[py][px][:, s:s + Lk]               # (C_in, Lk) bf16
            acc = acc + jnp.dot(w_ref[t], slab,
                                preferred_element_type=jnp.float32)
        acc = acc + b_ref[...]                               # broadcast (C_out,1)
        o_ref[0, :, :] = jnp.maximum(acc, 0.0).astype(o_ref.dtype)

    return kernel


# ------------------------------ JAX wrapper --------------------------------

@functools.partial(jax.jit, static_argnames=("stride", "padding"))
def down_operation_forward(x, weight, bias, *, stride=(1, 2, 2), padding=(0, 1, 1)):
    """x: (N, C_in, D, H, W); weight: (C_out, C_in, kd, kh, kw); bias: (C_out,)."""
    N, C_in, D, H, W = x.shape
    C_out, C_in_w, kd, kh, kw = weight.shape
    assert C_in_w == C_in
    assert stride == (1, 2, 2) and padding == (0, 1, 1)
    assert kh == 3 and kw == 3, "parity decomposition assumes a 3x3 spatial kernel"
    assert D >= kd

    # Output extents (PyTorch Conv3d formula).
    Do = D - kd + 1
    Ho = (H + 2 - kh) // 2 + 1
    Wo = (W + 2 - kw) // 2 + 1

    # Zero-pad H/W by 1 (conv padding), then up to even so the stride-2 parity
    # split is exact.  Extra padded rows/cols are zero and never feed kept outputs.
    Hp = H + 2 + ((H + 2) % 2)
    Wp = W + 2 + ((W + 2) % 2)
    Hh, Wh = Hp // 2, Wp // 2
    HW = Hh * Wh
    L = D * HW                                        # flattened input spatial
    Lk = (Do - 1) * HW + (Ho - 1) * Wh + Wo           # flat span of kept outputs

    # ---- activation relayout (cheap; replaces the old 27x HBM im2col) ----
    x_p = jnp.pad(x, ((0, 0), (0, 0), (0, 0),
                      (1, Hp - H - 1), (1, Wp - W - 1)))
    xs = x_p.reshape(N, C_in, D, Hh, 2, Wh, 2)
    xs = jnp.transpose(xs, (0, 4, 6, 1, 2, 3, 5))     # (N, 2, 2, C_in, D, Hh, Wh)
    xs = xs.reshape(N, 2, 2, C_in, L).astype(jnp.bfloat16)

    # Per-tap weight matrices (T, C_out, C_in), tap order = (dz, dy, dx).
    T = kd * kh * kw
    w_taps = jnp.transpose(weight, (2, 3, 4, 0, 1)).reshape(T, C_out, C_in)
    w_taps = w_taps.astype(jnp.bfloat16)
    b2 = bias.reshape(C_out, 1).astype(jnp.float32)

    taps = tuple((dz, dy, dx)
                 for dz in range(kd) for dy in range(kh) for dx in range(kw))
    kernel = _make_conv_relu_kernel(taps, C_out, Hh, Wh, Lk)

    out_flat = pl.pallas_call(
        kernel,
        out_shape=jax.ShapeDtypeStruct((N, C_out, Lk), jnp.float32),
        grid_spec=pltpu.PrefetchScalarGridSpec(
            num_scalar_prefetch=0,
            grid=(N,),
            in_specs=[
                pl.BlockSpec((1, 2, 2, C_in, L), lambda n: (n, 0, 0, 0, 0)),
                pl.BlockSpec((T, C_out, C_in), lambda n: (0, 0, 0)),
                pl.BlockSpec((C_out, 1), lambda n: (0, 0)),
            ],
            out_specs=pl.BlockSpec((1, C_out, Lk), lambda n: (n, 0, 0)),
        ),
        compiler_params=pltpu.CompilerParams(
            dimension_semantics=("parallel",)),
    )(xs, w_taps, b2)

    # Unpack the flattened (over-complete) spatial axis -> (Do, Ho, Wo).
    # Output is already channel-first, so no transpose is needed.
    out = jnp.pad(out_flat, ((0, 0), (0, 0), (0, L - Lk)))
    out = out.reshape(N, C_out, D, Hh, Wh)[:, :, :Do, :Ho, :Wo]
    return out


# ------------------------------- main ------------------------------------

if __name__ == "__main__":
    key = jax.random.PRNGKey(0)
    k_x, k_w, k_b = jax.random.split(key, 3)

    # Small shapes consistent with the module.
    batch, in_ch, out_ch = 2, 4, 8
    D, H, W = 4, 16, 16
    ksize = (3, 3, 3)

    x = jax.random.normal(k_x, (batch, in_ch, D, H, W), dtype=jnp.float32)

    # Deterministic synthetic parameters (PyTorch-like uniform fan-in scaling).
    fan_in = in_ch * ksize[0] * ksize[1] * ksize[2]
    bound = 1.0 / (fan_in ** 0.5)
    weight = jax.random.uniform(k_w, (out_ch, in_ch) + ksize,
                                minval=-bound, maxval=bound, dtype=jnp.float32)
    bias = jax.random.uniform(k_b, (out_ch,), minval=-bound, maxval=bound,
                              dtype=jnp.float32)

    out = down_operation_forward(x, weight, bias)
    out = jax.block_until_ready(out)

    # Sanity check against XLA's conv (same semantics as torch Conv3d + ReLU).
    ref = lax.conv_general_dilated(
        x, weight,
        window_strides=(1, 2, 2),
        padding=((0, 0), (1, 1), (1, 1)),
        dimension_numbers=("NCDHW", "OIDHW", "NCDHW"),
    ) + bias.reshape(1, out_ch, 1, 1, 1)
    ref = jnp.maximum(ref, 0.0)

    assert out.shape == ref.shape == (batch, out_ch, D - 2, H // 2, W // 2), out.shape
    # bf16 activations/weights with f32 accumulation -> loosened tolerance.
    max_err = float(jnp.max(jnp.abs(out - ref)))
    assert jnp.allclose(out, ref, atol=2e-2, rtol=2e-2), max_err

    print("KERNEL_OK")
</pallas_src>

<mosaic_0001>
module attributes {stable_mosaic.version = 11 : i64} {
  func.func @kernel(%arg0: i32, %arg1: memref<1x2x2x4x324xbf16, #tpu.memory_space<vmem>>, %arg2: memref<27x8x4xbf16, #tpu.memory_space<vmem>>, %arg3: memref<8x1xf32, #tpu.memory_space<vmem>>, %arg4: memref<1x8x152xf32, #tpu.memory_space<vmem>>) attributes {dimension_semantics = [#tpu.dimension_semantics<parallel>], iteration_bounds = array<i64: 2>, scalar_prefetch = 0 : i64, scratch_operands = 0 : i64, tpu.core_type = #tpu.core_type<tc>, window_params = [{transform_indices = @transform_0, window_bounds = array<i64: 1, 2, 2, 4, 324>}, {pipeline_mode = #tpu.pipeline_mode<synchronous>, transform_indices = @transform_1, window_bounds = array<i64: 27, 8, 4>}, {pipeline_mode = #tpu.pipeline_mode<synchronous>, transform_indices = @transform_2, window_bounds = array<i64: 8, 1>}, {transform_indices = @transform_3, window_bounds = array<i64: 1, 8, 152>}]} {
    %c0 = arith.constant 0 : index
    %c0_0 = arith.constant 0 : index
    %c0_1 = arith.constant 0 : index
    %c0_2 = arith.constant 0 : index
    %c0_3 = arith.constant 0 : index
    %0 = vector.load %arg1[%c0, %c0_0, %c0_1, %c0_2, %c0_3] : memref<1x2x2x4x324xbf16, #tpu.memory_space<vmem>>, vector<1x1x1x4x324xbf16>
    %1 = vector.shape_cast %0 : vector<1x1x1x4x324xbf16> to vector<4x324xbf16>
    %c0_4 = arith.constant 0 : index
    %c0_5 = arith.constant 0 : index
    %c1 = arith.constant 1 : index
    %c0_6 = arith.constant 0 : index
    %c0_7 = arith.constant 0 : index
    %2 = vector.load %arg1[%c0_4, %c0_5, %c1, %c0_6, %c0_7] : memref<1x2x2x4x324xbf16, #tpu.memory_space<vmem>>, vector<1x1x1x4x324xbf16>
    %3 = vector.shape_cast %2 : vector<1x1x1x4x324xbf16> to vector<4x324xbf16>
    %c0_8 = arith.constant 0 : index
    %c1_9 = arith.constant 1 : index
    %c0_10 = arith.constant 0 : index
    %c0_11 = arith.constant 0 : index
    %c0_12 = arith.constant 0 : index
    %4 = vector.load %arg1[%c0_8, %c1_9, %c0_10, %c0_11, %c0_12] : memref<1x2x2x4x324xbf16, #tpu.memory_space<vmem>>, vector<1x1x1x4x324xbf16>
    %5 = vector.shape_cast %4 : vector<1x1x1x4x324xbf16> to vector<4x324xbf16>
    %c0_13 = arith.constant 0 : index
    %c1_14 = arith.constant 1 : index
    %c1_15 = arith.constant 1 : index
    %c0_16 = arith.constant 0 : index
    %c0_17 = arith.constant 0 : index
    %6 = vector.load %arg1[%c0_13, %c1_14, %c1_15, %c0_16, %c0_17] : memref<1x2x2x4x324xbf16, #tpu.memory_space<vmem>>, vector<1x1x1x4x324xbf16>
    %7 = vector.shape_cast %6 : vector<1x1x1x4x324xbf16> to vector<4x324xbf16>
    %cst = arith.constant 0.000000e+00 : f32
    %8 = vector.broadcast %cst : f32 to vector<8x152xf32>
    %9 = vector.extract_strided_slice %1 {offsets = [0, 0], sizes = [4, 152], strides = [1, 1]} : vector<4x324xbf16> to vector<4x152xbf16>
    %c0_18 = arith.constant 0 : index
    %c0_19 = arith.constant 0 : index
    %c0_20 = arith.constant 0 : index
    %10 = vector.load %arg2[%c0_18, %c0_19, %c0_20] : memref<27x8x4xbf16, #tpu.memory_space<vmem>>, vector<1x8x4xbf16>
    %11 = vector.shape_cast %10 : vector<1x8x4xbf16> to vector<8x4xbf16>
    %cst_21 = arith.constant dense<0.000000e+00> : vector<8x152xf32>
    %12 = tpu.matmul %11, %9, %cst_21 {dimension_numbers = #tpu.dot_dimension_numbers<[1], [0], [0], [1], [0, 0, 1, 1], [], []>} : vector<8x4xbf16>, vector<4x152xbf16>, vector<8x152xf32> -> vector<8x152xf32>
    %13 = arith.addf %8, %12 : vector<8x152xf32>
    %14 = vector.extract_strided_slice %3 {offsets = [0, 0], sizes = [4, 152], strides = [1, 1]} : vector<4x324xbf16> to vector<4x152xbf16>
    %c1_22 = arith.constant 1 : index
    %c0_23 = arith.constant 0 : index
    %c0_24 = arith.constant 0 : index
    %15 = vector.load %arg2[%c1_22, %c0_23, %c0_24] : memref<27x8x4xbf16, #tpu.memory_space<vmem>>, vector<1x8x4xbf16>
    %16 = vector.shape_cast %15 : vector<1x8x4xbf16> to vector<8x4xbf16>
    %cst_25 = arith.constant dense<0.000000e+00> : vector<8x152xf32>
    %17 = tpu.matmul %16, %14, %cst_25 {dimension_numbers = #tpu.dot_dimension_numbers<[1], [0], [0], [1], [0, 0, 1, 1], [], []>} : vector<8x4xbf16>, vector<4x152xbf16>, vector<8x152xf32> -> vector<8x152xf32>
    %18 = arith.addf %13, %17 : vector<8x152xf32>
    %19 = vector.extract_strided_slice %1 {offsets = [0, 1], sizes = [4, 152], strides = [1, 1]} : vector<4x324xbf16> to vector<4x152xbf16>
    %c2 = arith.constant 2 : index
    %c0_26 = arith.constant 0 : index
    %c0_27 = arith.constant 0 : index
    %20 = vector.load %arg2[%c2, %c0_26, %c0_27] : memref<27x8x4xbf16, #tpu.memory_space<vmem>>, vector<1x8x4xbf16>
    %21 = vector.shape_cast %20 : vector<1x8x4xbf16> to vector<8x4xbf16>
    %cst_28 = arith.constant dense<0.000000e+00> : vector<8x152xf32>
    %22 = tpu.matmul %21, %19, %cst_28 {dimension_numbers = #tpu.dot_dimension_numbers<[1], [0], [0], [1], [0, 0, 1, 1], [], []>} : vector<8x4xbf16>, vector<4x152xbf16>, vector<8x152xf32> -> vector<8x152xf32>
    %23 = arith.addf %18, %22 : vector<8x152xf32>
    %24 = vector.extract_strided_slice %5 {offsets = [0, 0], sizes = [4, 152], strides = [1, 1]} : vector<4x324xbf16> to vector<4x152xbf16>
    %c3 = arith.constant 3 : index
    %c0_29 = arith.constant 0 : index
    %c0_30 = arith.constant 0 : index
    %25 = vector.load %arg2[%c3, %c0_29, %c0_30] : memref<27x8x4xbf16, #tpu.memory_space<vmem>>, vector<1x8x4xbf16>
    %26 = vector.shape_cast %25 : vector<1x8x4xbf16> to vector<8x4xbf16>
    %cst_31 = arith.constant dense<0.000000e+00> : vector<8x152xf32>
    %27 = tpu.matmul %26, %24, %cst_31 {dimension_numbers = #tpu.dot_dimension_numbers<[1], [0], [0], [1], [0, 0, 1, 1], [], []>} : vector<8x4xbf16>, vector<4x152xbf16>, vector<8x152xf32> -> vector<8x152xf32>
    %28 = arith.addf %23, %27 : vector<8x152xf32>
    %29 = vector.extract_strided_slice %7 {offsets = [0, 0], sizes = [4, 152], strides = [1, 1]} : vector<4x324xbf16> to vector<4x152xbf16>
    %c4 = arith.constant 4 : index
    %c0_32 = arith.constant 0 : index
    %c0_33 = arith.constant 0 : index
    %30 = vector.load %arg2[%c4, %c0_32, %c0_33] : memref<27x8x4xbf16, #tpu.memory_space<vmem>>, vector<1x8x4xbf16>
    %31 = vector.shape_cast %30 : vector<1x8x4xbf16> to vector<8x4xbf16>
    %cst_34 = arith.constant dense<0.000000e+00> : vector<8x152xf32>
    %32 = tpu.matmul %31, %29, %cst_34 {dimension_numbers = #tpu.dot_dimension_numbers<[1], [0], [0], [1], [0, 0, 1, 1], [], []>} : vector<8x4xbf16>, vector<4x152xbf16>, vector<8x152xf32> -> vector<8x152xf32>
    %33 = arith.addf %28, %32 : vector<8x152xf32>
    %34 = vector.extract_strided_slice %5 {offsets = [0, 1], sizes = [4, 152], strides = [1, 1]} : vector<4x324xbf16> to vector<4x152xbf16>
    %c5 = arith.constant 5 : index
    %c0_35 = arith.constant 0 : index
    %c0_36 = arith.constant 0 : index
    %35 = vector.load %arg2[%c5, %c0_35, %c0_36] : memref<27x8x4xbf16, #tpu.memory_space<vmem>>, vector<1x8x4xbf16>
    %36 = vector.shape_cast %35 : vector<1x8x4xbf16> to vector<8x4xbf16>
    %cst_37 = arith.constant dense<0.000000e+00> : vector<8x152xf32>
    %37 = tpu.matmul %36, %34, %cst_37 {dimension_numbers = #tpu.dot_dimension_numbers<[1], [0], [0], [1], [0, 0, 1, 1], [], []>} : vector<8x4xbf16>, vector<4x152xbf16>, vector<8x152xf32> -> vector<8x152xf32>
    %38 = arith.addf %33, %37 : vector<8x152xf32>
    %39 = vector.extract_strided_slice %1 {offsets = [0, 9], sizes = [4, 152], strides = [1, 1]} : vector<4x324xbf16> to vector<4x152xbf16>
    %c6 = arith.constant 6 : index
    %c0_38 = arith.constant 0 : index
    %c0_39 = arith.constant 0 : index
    %40 = vector.load %arg2[%c6, %c0_38, %c0_39] : memref<27x8x4xbf16, #tpu.memory_space<vmem>>, vector<1x8x4xbf16>
    %41 = vector.shape_cast %40 : vector<1x8x4xbf16> to vector<8x4xbf16>
    %cst_40 = arith.constant dense<0.000000e+00> : vector<8x152xf32>
    %42 = tpu.matmul %41, %39, %cst_40 {dimension_numbers = #tpu.dot_dimension_numbers<[1], [0], [0], [1], [0, 0, 1, 1], [], []>} : vector<8x4xbf16>, vector<4x152xbf16>, vector<8x152xf32> -> vector<8x152xf32>
    %43 = arith.addf %38, %42 : vector<8x152xf32>
    %44 = vector.extract_strided_slice %3 {offsets = [0, 9], sizes = [4, 152], strides = [1, 1]} : vector<4x324xbf16> to vector<4x152xbf16>
    %c7 = arith.constant 7 : index
    %c0_41 = arith.constant 0 : index
    %c0_42 = arith.constant 0 : index
    %45 = vector.load %arg2[%c7, %c0_41, %c0_42] : memref<27x8x4xbf16, #tpu.memory_space<vmem>>, vector<1x8x4xbf16>
    %46 = vector.shape_cast %45 : vector<1x8x4xbf16> to vector<8x4xbf16>
    %cst_43 = arith.constant dense<0.000000e+00> : vector<8x152xf32>
    %47 = tpu.matmul %46, %44, %cst_43 {dimension_numbers = #tpu.dot_dimension_numbers<[1], [0], [0], [1], [0, 0, 1, 1], [], []>} : vector<8x4xbf16>, vector<4x152xbf16>, vector<8x152xf32> -> vector<8x152xf32>
    %48 = arith.addf %43, %47 : vector<8x152xf32>
    %49 = vector.extract_strided_slice %1 {offsets = [0, 10], sizes = [4, 152], strides = [1, 1]} : vector<4x324xbf16> to vector<4x152xbf16>
    %c8 = arith.constant 8 : index
    %c0_44 = arith.constant 0 : index
    %c0_45 = arith.constant 0 : index
    %50 = vector.load %arg2[%c8, %c0_44, %c0_45] : memref<27x8x4xbf16, #tpu.memory_space<vmem>>, vector<1x8x4xbf16>
    %51 = vector.shape_cast %50 : vector<1x8x4xbf16> to vector<8x4xbf16>
    %cst_46 = arith.constant dense<0.000000e+00> : vector<8x152xf32>
    %52 = tpu.matmul %51, %49, %cst_46 {dimension_numbers = #tpu.dot_dimension_numbers<[1], [0], [0], [1], [0, 0, 1, 1], [], []>} : vector<8x4xbf16>, vector<4x152xbf16>, vector<8x152xf32> -> vector<8x152xf32>
    %53 = arith.addf %48, %52 : vector<8x152xf32>
    %54 = vector.extract_strided_slice %1 {offsets = [0, 81], sizes = [4, 152], strides = [1, 1]} : vector<4x324xbf16> to vector<4x152xbf16>
    %c9 = arith.constant 9 : index
    %c0_47 = arith.constant 0 : index
    %c0_48 = arith.constant 0 : index
    %55 = vector.load %arg2[%c9, %c0_47, %c0_48] : memref<27x8x4xbf16, #tpu.memory_space<vmem>>, vector<1x8x4xbf16>
    %56 = vector.shape_cast %55 : vector<1x8x4xbf16> to vector<8x4xbf16>
    %cst_49 = arith.constant dense<0.000000e+00> : vector<8x152xf32>
    %57 = tpu.matmul %56, %54, %cst_49 {dimension_numbers = #tpu.dot_dimension_numbers<[1], [0], [0], [1], [0, 0, 1, 1], [], []>} : vector<8x4xbf16>, vector<4x152xbf16>, vector<8x152xf32> -> vector<8x152xf32>
    %58 = arith.addf %53, %57 : vector<8x152xf32>
    %59 = vector.extract_strided_slice %3 {offsets = [0, 81], sizes = [4, 152], strides = [1, 1]} : vector<4x324xbf16> to vector<4x152xbf16>
    %c10 = arith.constant 10 : index
    %c0_50 = arith.constant 0 : index
    %c0_51 = arith.constant 0 : index
    %60 = vector.load %arg2[%c10, %c0_50, %c0_51] : memref<27x8x4xbf16, #tpu.memory_space<vmem>>, vector<1x8x4xbf16>
    %61 = vector.shape_cast %60 : vector<1x8x4xbf16> to vector<8x4xbf16>
    %cst_52 = arith.constant dense<0.000000e+00> : vector<8x152xf32>
    %62 = tpu.matmul %61, %59, %cst_52 {dimension_numbers = #tpu.dot_dimension_numbers<[1], [0], [0], [1], [0, 0, 1, 1], [], []>} : vector<8x4xbf16>, vector<4x152xbf16>, vector<8x152xf32> -> vector<8x152xf32>
    %63 = arith.addf %58, %62 : vector<8x152xf32>
    %64 = vector.extract_strided_slice %1 {offsets = [0, 82], sizes = [4, 152], strides = [1, 1]} : vector<4x324xbf16> to vector<4x152xbf16>
    %c11 = arith.constant 11 : index
    %c0_53 = arith.constant 0 : index
    %c0_54 = arith.constant 0 : index
    %65 = vector.load %arg2[%c11, %c0_53, %c0_54] : memref<27x8x4xbf16, #tpu.memory_space<vmem>>, vector<1x8x4xbf16>
    %66 = vector.shape_cast %65 : vector<1x8x4xbf16> to vector<8x4xbf16>
    %cst_55 = arith.constant dense<0.000000e+00> : vector<8x152xf32>
    %67 = tpu.matmul %66, %64, %cst_55 {dimension_numbers = #tpu.dot_dimension_numbers<[1], [0], [0], [1], [0, 0, 1, 1], [], []>} : vector<8x4xbf16>, vector<4x152xbf16>, vector<8x152xf32> -> vector<8x152xf32>
    %68 = arith.addf %63, %67 : vector<8x152xf32>
    %69 = vector.extract_strided_slice %5 {offsets = [0, 81], sizes = [4, 152], strides = [1, 1]} : vector<4x324xbf16> to vector<4x152xbf16>
    %c12 = arith.constant 12 : index
    %c0_56 = arith.constant 0 : index
    %c0_57 = arith.constant 0 : index
    %70 = vector.load %arg2[%c12, %c0_56, %c0_57] : memref<27x8x4xbf16, #tpu.memory_space<vmem>>, vector<1x8x4xbf16>
    %71 = vector.shape_cast %70 : vector<1x8x4xbf16> to vector<8x4xbf16>
    %cst_58 = arith.constant dense<0.000000e+00> : vector<8x152xf32>
    %72 = tpu.matmul %71, %69, %cst_58 {dimension_numbers = #tpu.dot_dimension_numbers<[1], [0], [0], [1], [0, 0, 1, 1], [], []>} : vector<8x4xbf16>, vector<4x152xbf16>, vector<8x152xf32> -> vector<8x152xf32>
    %73 = arith.addf %68, %72 : vector<8x152xf32>
    %74 = vector.extract_strided_slice %7 {offsets = [0, 81], sizes = [4, 152], strides = [1, 1]} : vector<4x324xbf16> to vector<4x152xbf16>
    %c13 = arith.constant 13 : index
    %c0_59 = arith.constant 0 : index
    %c0_60 = arith.constant 0 : index
    %75 = vector.load %arg2[%c13, %c0_59, %c0_60] : memref<27x8x4xbf16, #tpu.memory_space<vmem>>, vector<1x8x4xbf16>
    %76 = vector.shape_cast %75 : vector<1x8x4xbf16> to vector<8x4xbf16>
    %cst_61 = arith.constant dense<0.000000e+00> : vector<8x152xf32>
    %77 = tpu.matmul %76, %74, %cst_61 {dimension_numbers = #tpu.dot_dimension_numbers<[1], [0], [0], [1], [0, 0, 1, 1], [], []>} : vector<8x4xbf16>, vector<4x152xbf16>, vector<8x152xf32> -> vector<8x152xf32>
    %78 = arith.addf %73, %77 : vector<8x152xf32>
    %79 = vector.extract_strided_slice %5 {offsets = [0, 82], sizes = [4, 152], strides = [1, 1]} : vector<4x324xbf16> to vector<4x152xbf16>
    %c14 = arith.constant 14 : index
    %c0_62 = arith.constant 0 : index
    %c0_63 = arith.constant 0 : index
    %80 = vector.load %arg2[%c14, %c0_62, %c0_63] : memref<27x8x4xbf16, #tpu.memory_space<vmem>>, vector<1x8x4xbf16>
    %81 = vector.shape_cast %80 : vector<1x8x4xbf16> to vector<8x4xbf16>
    %cst_64 = arith.constant dense<0.000000e+00> : vector<8x152xf32>
    %82 = tpu.matmul %81, %79, %cst_64 {dimension_numbers = #tpu.dot_dimension_numbers<[1], [0], [0], [1], [0, 0, 1, 1], [], []>} : vector<8x4xbf16>, vector<4x152xbf16>, vector<8x152xf32> -> vector<8x152xf32>
    %83 = arith.addf %78, %82 : vector<8x152xf32>
    %84 = vector.extract_strided_slice %1 {offsets = [0, 90], sizes = [4, 152], strides = [1, 1]} : vector<4x324xbf16> to vector<4x152xbf16>
    %c15 = arith.constant 15 : index
    %c0_65 = arith.constant 0 : index
    %c0_66 = arith.constant 0 : index
    %85 = vector.load %arg2[%c15, %c0_65, %c0_66] : memref<27x8x4xbf16, #tpu.memory_space<vmem>>, vector<1x8x4xbf16>
    %86 = vector.shape_cast %85 : vector<1x8x4xbf16> to vector<8x4xbf16>
    %cst_67 = arith.constant dense<0.000000e+00> : vector<8x152xf32>
    %87 = tpu.matmul %86, %84, %cst_67 {dimension_numbers = #tpu.dot_dimension_numbers<[1], [0], [0], [1], [0, 0, 1, 1], [], []>} : vector<8x4xbf16>, vector<4x152xbf16>, vector<8x152xf32> -> vector<8x152xf32>
    %88 = arith.addf %83, %87 : vector<8x152xf32>
    %89 = vector.extract_strided_slice %3 {offsets = [0, 90], sizes = [4, 152], strides = [1, 1]} : vector<4x324xbf16> to vector<4x152xbf16>
    %c16 = arith.constant 16 : index
    %c0_68 = arith.constant 0 : index
    %c0_69 = arith.constant 0 : index
    %90 = vector.load %arg2[%c16, %c0_68, %c0_69] : memref<27x8x4xbf16, #tpu.memory_space<vmem>>, vector<1x8x4xbf16>
    %91 = vector.shape_cast %90 : vector<1x8x4xbf16> to vector<8x4xbf16>
    %cst_70 = arith.constant dense<0.000000e+00> : vector<8x152xf32>
    %92 = tpu.matmul %91, %89, %cst_70 {dimension_numbers = #tpu.dot_dimension_numbers<[1], [0], [0], [1], [0, 0, 1, 1], [], []>} : vector<8x4xbf16>, vector<4x152xbf16>, vector<8x152xf32> -> vector<8x152xf32>
    %93 = arith.addf %88, %92 : vector<8x152xf32>
    %94 = vector.extract_strided_slice %1 {offsets = [0, 91], sizes = [4, 152], strides = [1, 1]} : vector<4x324xbf16> to vector<4x152xbf16>
    %c17 = arith.constant 17 : index
    %c0_71 = arith.constant 0 : index
    %c0_72 = arith.constant 0 : index
    %95 = vector.load %arg2[%c17, %c0_71, %c0_72] : memref<27x8x4xbf16, #tpu.memory_space<vmem>>, vector<1x8x4xbf16>
    %96 = vector.shape_cast %95 : vector<1x8x4xbf16> to vector<8x4xbf16>
    %cst_73 = arith.constant dense<0.000000e+00> : vector<8x152xf32>
    %97 = tpu.matmul %96, %94, %cst_73 {dimension_numbers = #tpu.dot_dimension_numbers<[1], [0], [0], [1], [0, 0, 1, 1], [], []>} : vector<8x4xbf16>, vector<4x152xbf16>, vector<8x152xf32> -> vector<8x152xf32>
    %98 = arith.addf %93, %97 : vector<8x152xf32>
    %99 = vector.extract_strided_slice %1 {offsets = [0, 162], sizes = [4, 152], strides = [1, 1]} : vector<4x324xbf16> to vector<4x152xbf16>
    %c18 = arith.constant 18 : index
    %c0_74 = arith.constant 0 : index
    %c0_75 = arith.constant 0 : index
    %100 = vector.load %arg2[%c18, %c0_74, %c0_75] : memref<27x8x4xbf16, #tpu.memory_space<vmem>>, vector<1x8x4xbf16>
    %101 = vector.shape_cast %100 : vector<1x8x4xbf16> to vector<8x4xbf16>
    %cst_76 = arith.constant dense<0.000000e+00> : vector<8x152xf32>
    %102 = tpu.matmul %101, %99, %cst_76 {dimension_numbers = #tpu.dot_dimension_numbers<[1], [0], [0], [1], [0, 0, 1, 1], [], []>} : vector<8x4xbf16>, vector<4x152xbf16>, vector<8x152xf32> -> vector<8x152xf32>
    %103 = arith.addf %98, %102 : vector<8x152xf32>
    %104 = vector.extract_strided_slice %3 {offsets = [0, 162], sizes = [4, 152], strides = [1, 1]} : vector<4x324xbf16> to vector<4x152xbf16>
    %c19 = arith.constant 19 : index
    %c0_77 = arith.constant 0 : index
    %c0_78 = arith.constant 0 : index
    %105 = vector.load %arg2[%c19, %c0_77, %c0_78] : memref<27x8x4xbf16, #tpu.memory_space<vmem>>, vector<1x8x4xbf16>
    %106 = vector.shape_cast %105 : vector<1x8x4xbf16> to vector<8x4xbf16>
    %cst_79 = arith.constant dense<0.000000e+00> : vector<8x152xf32>
    %107 = tpu.matmul %106, %104, %cst_79 {dimension_numbers = #tpu.dot_dimension_numbers<[1], [0], [0], [1], [0, 0, 1, 1], [], []>} : vector<8x4xbf16>, vector<4x152xbf16>, vector<8x152xf32> -> vector<8x152xf32>
    %108 = arith.addf %103, %107 : vector<8x152xf32>
    %109 = vector.extract_strided_slice %1 {offsets = [0, 163], sizes = [4, 152], strides = [1, 1]} : vector<4x324xbf16> to vector<4x152xbf16>
    %c20 = arith.constant 20 : index
    %c0_80 = arith.constant 0 : index
    %c0_81 = arith.constant 0 : index
    %110 = vector.load %arg2[%c20, %c0_80, %c0_81] : memref<27x8x4xbf16, #tpu.memory_space<vmem>>, vector<1x8x4xbf16>
    %111 = vector.shape_cast %110 : vector<1x8x4xbf16> to vector<8x4xbf16>
    %cst_82 = arith.constant dense<0.000000e+00> : vector<8x152xf32>
    %112 = tpu.matmul %111, %109, %cst_82 {dimension_numbers = #tpu.dot_dimension_numbers<[1], [0], [0], [1], [0, 0, 1, 1], [], []>} : vector<8x4xbf16>, vector<4x152xbf16>, vector<8x152xf32> -> vector<8x152xf32>
    %113 = arith.addf %108, %112 : vector<8x152xf32>
    %114 = vector.extract_strided_slice %5 {offsets = [0, 162], sizes = [4, 152], strides = [1, 1]} : vector<4x324xbf16> to vector<4x152xbf16>
    %c21 = arith.constant 21 : index
    %c0_83 = arith.constant 0 : index
    %c0_84 = arith.constant 0 : index
    %115 = vector.load %arg2[%c21, %c0_83, %c0_84] : memref<27x8x4xbf16, #tpu.memory_space<vmem>>, vector<1x8x4xbf16>
    %116 = vector.shape_cast %115 : vector<1x8x4xbf16> to vector<8x4xbf16>
    %cst_85 = arith.constant dense<0.000000e+00> : vector<8x152xf32>
    %117 = tpu.matmul %116, %114, %cst_85 {dimension_numbers = #tpu.dot_dimension_numbers<[1], [0], [0], [1], [0, 0, 1, 1], [], []>} : vector<8x4xbf16>, vector<4x152xbf16>, vector<8x152xf32> -> vector<8x152xf32>
    %118 = arith.addf %113, %117 : vector<8x152xf32>
    %119 = vector.extract_strided_slice %7 {offsets = [0, 162], sizes = [4, 152], strides = [1, 1]} : vector<4x324xbf16> to vector<4x152xbf16>
    %c22 = arith.constant 22 : index
    %c0_86 = arith.constant 0 : index
    %c0_87 = arith.constant 0 : index
    %120 = vector.load %arg2[%c22, %c0_86, %c0_87] : memref<27x8x4xbf16, #tpu.memory_space<vmem>>, vector<1x8x4xbf16>
    %121 = vector.shape_cast %120 : vector<1x8x4xbf16> to vector<8x4xbf16>
    %cst_88 = arith.constant dense<0.000000e+00> : vector<8x152xf32>
    %122 = tpu.matmul %121, %119, %cst_88 {dimension_numbers = #tpu.dot_dimension_numbers<[1], [0], [0], [1], [0, 0, 1, 1], [], []>} : vector<8x4xbf16>, vector<4x152xbf16>, vector<8x152xf32> -> vector<8x152xf32>
    %123 = arith.addf %118, %122 : vector<8x152xf32>
    %124 = vector.extract_strided_slice %5 {offsets = [0, 163], sizes = [4, 152], strides = [1, 1]} : vector<4x324xbf16> to vector<4x152xbf16>
    %c23 = arith.constant 23 : index
    %c0_89 = arith.constant 0 : index
    %c0_90 = arith.constant 0 : index
    %125 = vector.load %arg2[%c23, %c0_89, %c0_90] : memref<27x8x4xbf16, #tpu.memory_space<vmem>>, vector<1x8x4xbf16>
    %126 = vector.shape_cast %125 : vector<1x8x4xbf16> to vector<8x4xbf16>
    %cst_91 = arith.constant dense<0.000000e+00> : vector<8x152xf32>
    %127 = tpu.matmul %126, %124, %cst_91 {dimension_numbers = #tpu.dot_dimension_numbers<[1], [0], [0], [1], [0, 0, 1, 1], [], []>} : vector<8x4xbf16>, vector<4x152xbf16>, vector<8x152xf32> -> vector<8x152xf32>
    %128 = arith.addf %123, %127 : vector<8x152xf32>
    %129 = vector.extract_strided_slice %1 {offsets = [0, 171], sizes = [4, 152], strides = [1, 1]} : vector<4x324xbf16> to vector<4x152xbf16>
    %c24 = arith.constant 24 : index
    %c0_92 = arith.constant 0 : index
    %c0_93 = arith.constant 0 : index
    %130 = vector.load %arg2[%c24, %c0_92, %c0_93] : memref<27x8x4xbf16, #tpu.memory_space<vmem>>, vector<1x8x4xbf16>
    %131 = vector.shape_cast %130 : vector<1x8x4xbf16> to vector<8x4xbf16>
    %cst_94 = arith.constant dense<0.000000e+00> : vector<8x152xf32>
    %132 = tpu.matmul %131, %129, %cst_94 {dimension_numbers = #tpu.dot_dimension_numbers<[1], [0], [0], [1], [0, 0, 1, 1], [], []>} : vector<8x4xbf16>, vector<4x152xbf16>, vector<8x152xf32> -> vector<8x152xf32>
    %133 = arith.addf %128, %132 : vector<8x152xf32>
    %134 = vector.extract_strided_slice %3 {offsets = [0, 171], sizes = [4, 152], strides = [1, 1]} : vector<4x324xbf16> to vector<4x152xbf16>
    %c25 = arith.constant 25 : index
    %c0_95 = arith.constant 0 : index
    %c0_96 = arith.constant 0 : index
    %135 = vector.load %arg2[%c25, %c0_95, %c0_96] : memref<27x8x4xbf16, #tpu.memory_space<vmem>>, vector<1x8x4xbf16>
    %136 = vector.shape_cast %135 : vector<1x8x4xbf16> to vector<8x4xbf16>
    %cst_97 = arith.constant dense<0.000000e+00> : vector<8x152xf32>
    %137 = tpu.matmul %136, %134, %cst_97 {dimension_numbers = #tpu.dot_dimension_numbers<[1], [0], [0], [1], [0, 0, 1, 1], [], []>} : vector<8x4xbf16>, vector<4x152xbf16>, vector<8x152xf32> -> vector<8x152xf32>
    %138 = arith.addf %133, %137 : vector<8x152xf32>
    %139 = vector.extract_strided_slice %1 {offsets = [0, 172], sizes = [4, 152], strides = [1, 1]} : vector<4x324xbf16> to vector<4x152xbf16>
    %c26 = arith.constant 26 : index
    %c0_98 = arith.constant 0 : index
    %c0_99 = arith.constant 0 : index
    %140 = vector.load %arg2[%c26, %c0_98, %c0_99] : memref<27x8x4xbf16, #tpu.memory_space<vmem>>, vector<1x8x4xbf16>
    %141 = vector.shape_cast %140 : vector<1x8x4xbf16> to vector<8x4xbf16>
    %cst_100 = arith.constant dense<0.000000e+00> : vector<8x152xf32>
    %142 = tpu.matmul %141, %139, %cst_100 {dimension_numbers = #tpu.dot_dimension_numbers<[1], [0], [0], [1], [0, 0, 1, 1], [], []>} : vector<8x4xbf16>, vector<4x152xbf16>, vector<8x152xf32> -> vector<8x152xf32>
    %143 = arith.addf %138, %142 : vector<8x152xf32>
    %c0_101 = arith.constant 0 : index
    %c0_102 = arith.constant 0 : index
    %144 = vector.load %arg3[%c0_101, %c0_102] : memref<8x1xf32, #tpu.memory_space<vmem>>, vector<8x1xf32>
    %145 = vector.broadcast %144 : vector<8x1xf32> to vector<8x152xf32>
    %146 = arith.addf %143, %145 : vector<8x152xf32>
    %cst_103 = arith.constant 0.000000e+00 : f32
    %147 = vector.broadcast %cst_103 : f32 to vector<8x152xf32>
    %148 = arith.maximumf %146, %147 : vector<8x152xf32>
    %c0_104 = arith.constant 0 : index
    %c0_105 = arith.constant 0 : index
    %c0_106 = arith.constant 0 : index
    %149 = vector.load %arg4[%c0_104, %c0_105, %c0_106] : memref<1x8x152xf32, #tpu.memory_space<vmem>>, vector<1x8x152xf32>
    %150 = vector.shape_cast %149 : vector<1x8x152xf32> to vector<8x152xf32>
    %151 = vector.shape_cast %148 : vector<8x152xf32> to vector<1x8x152xf32>
    tpu.vector_store %arg4[%c0_104, %c0_105, %c0_106], %151 {strides = array<i32>} : memref<1x8x152xf32, #tpu.memory_space<vmem>>, vector<1x8x152xf32>,
    return
  }
  func.func @transform_0(%arg0: i32) -> (i32, i32, i32, i32, i32) {
    %c0_i32 = arith.constant 0 : i32
    %c0_i32_0 = arith.constant 0 : i32
    %c0_i32_1 = arith.constant 0 : i32
    %c0_i32_2 = arith.constant 0 : i32
    %c0_i32_3 = arith.constant 0 : i32
    return %arg0, %c0_i32, %c0_i32_0, %c0_i32_1, %c0_i32_2 : i32, i32, i32, i32, i32
  }
  func.func @transform_1(%arg0: i32) -> (i32, i32, i32) {
    %c0_i32 = arith.constant 0 : i32
    %c0_i32_0 = arith.constant 0 : i32
    %c0_i32_1 = arith.constant 0 : i32
    %c0_i32_2 = arith.constant 0 : i32
    return %c0_i32, %c0_i32_0, %c0_i32_1 : i32, i32, i32
  }
  func.func @transform_2(%arg0: i32) -> (i32, i32) {
    %c0_i32 = arith.constant 0 : i32
    %c0_i32_0 = arith.constant 0 : i32
    %c0_i32_1 = arith.constant 0 : i32
    return %c0_i32, %c0_i32_0 : i32, i32
  }
  func.func @transform_3(%arg0: i32) -> (i32, i32, i32) {
    %c0_i32 = arith.constant 0 : i32
    %c0_i32_0 = arith.constant 0 : i32
    %c0_i32_1 = arith.constant 0 : i32
    return %arg0, %c0_i32, %c0_i32_0 : i32, i32, i32
  }
}

</mosaic_0001>

<bundles_post_ra>
// kernel: down_operation_forward.1
= control target key start
LH: loop header
LB: loop body
LE: loop exit
PB: predicated region body
PF: predicated region fallthrough
CT: control target
= control target key end

     0   :  { %s2058_s12 = smov 0   ;;  %s2358_s0 = inlined_call_operand.vmem [shape: bf16[2,2,2,4,324], index: 0, kind: input, shape index: {}]   ;;  %s2359_s1 = inlined_call_operand.vmem [shape: bf16[27,8,4], index: 1, kind: input, shape index: {}]   ;;  %s2360_s2 = inlined_call_operand.vmem [shape: f32[8,1], index: 2, kind: input, shape index: {}]   ;;  %s2361_s3 = inlined_call_operand.vmem [shape: f32[2,8,152], index: 3, kind: output, shape index: {}]  }
   0x1 LB: > { %s1896_s13 = sadd.s32 4294967295, %s2023_s12   ;;  %p1900_p0 = scmp.ge.s32.totalorder %s2023_s12, 1  ;;  %s2023_s12 = sphi %s2058_s12, %s13_s12  }
   0x2   : > { %p137_p1 = scmp.lt.s32.totalorder %s2023_s12, 3 }
   0x4   : > { %p138_p2 = pnand %p1900_p0, %p137_p1 }
   0x5   : > { %p161_p3 = scmp.lt.s32.totalorder (!%p138_p2), %s1896_s13, 1  ;;  %v186_v0 = vlaneseq (!%p138_p2)  ;;  %v2025_v1 = vmov (!%p138_p2), 1983009808   ;;  %v2026_v3 = vmov (!%p138_p2), 0   ;;  %vm195_vm0 = vcmask (!%p138_p2), 1041408   ;;  %s2027_s18 = smov (!%p138_p2), 127  }
   0x6   : > { %141 = sbr.rel (%p138_p2) target bundleno = 460 (0x1cc), region = 32  ;;  %v184_v2 = vunpack.c.l.s4 (!%p138_p2), %v2025_v1  ;;  %234 = vmatprep.mubr.bf16.mxu0 (!%p138_p2), %v2026_v3  ;;  %293 = vmatprep.mubr.bf16.mxu1 (!%p138_p2), %v2026_v3  ;;  %v1907_v20 = vld [vmem:[%s2359_s1 + $0x4] sm:$0xf] (!%p138_p2)  ;;  %vm191_vm1 = vcmask (!%p138_p2), 31744   ;;  %v179_v21 = vld [vmem:[%s2359_s1] sm:$0xf] (!%p138_p2) }
   0x7   : > { %v187_v4 = vshrl.u32 (!%p138_p2), %v186_v0, 7  ;;  %2012 = vset.pattern.permute.xlu0 (!%p138_p2), %v2026_v3  ;;  %s2028_s23 = smov (!%p138_p2), 119   ;;  %v1915_v23 = vld [vmem:[%s2359_s1 + $0xc] sm:$0xf] (!%p138_p2)  ;;  %s2029_s26 = smov (!%p138_p2), 118   ;;  %v1828_v33 = vld [vmem:[%s2360_s2] sm:$0xff] (!%p138_p2) }
   0x8   : > { %v185_v5 = vunpack.c.0.s8 (!%p138_p2), %v184_v2  ;;  %s2030_s27 = smov (!%p138_p2), 47   ;;  %s2031_s28 = smov (!%p138_p2), 46   ;;  %vm308_vm2 = vcmask (!%p138_p2), 1039360   ;;  %v1912_v42 = vld [vmem:[%s2359_s1 + $0x8] sm:$0xf] (!%p138_p2)  ;;  %vm553_vm3 = vcmask (!%p138_p2), 973824  }
   0x9   : > { %s2032_s29 = smov (!%p138_p2), 38   ;;  %s2033_s30 = smov (!%p138_p2), 37   ;;  %v1921_v43 = vld [vmem:[%s2359_s1 + $0x14] sm:$0xf] (!%p138_p2)  ;;  %v1918_v52 = vld [vmem:[%s2359_s1 + $0x10] sm:$0xf] (!%p138_p2) }
   0xa   : > { %v2072_v6 = vsub.s32 (!%p138_p2), %v185_v5, %v187_v4  ;;  %s2034_s4 = smov (!%p138_p2), 94   ;;  %s2035_s5 = smov (!%p138_p2), 93   ;;  %v1927_v53 = vld [vmem:[%s2359_s1 + $0x1c] sm:$0xf] (!%p138_p2)  ;;  %vm672_vm4 = vcmask (!%p138_p2), 965632   ;;  %vm732_vm5 = vcmask (!%p138_p2), 384000  }
   0xb   : > { %s2036_s6 = smov (!%p138_p2), 85   ;;  %s2037_s7 = smov (!%p138_p2), 84   ;;  %v1924_v62 = vld [vmem:[%s2359_s1 + $0x18] sm:$0xf] (!%p138_p2)  ;;  %v1933_v63 = vld [vmem:[%s2359_s1 + $0x24] sm:$0xf] (!%p138_p2) }
   0xc   : > { %vm851_vm6 = vcmask (!%p138_p2), 375808   ;;  %vm1088_vm7 = vcmask (!%p138_p2), 310272   ;;  %vm1207_vm8 = vcmask (!%p138_p2), 302080   ;;  %vm1275_vm9 = vcmask (!%p138_p2), 769024  }
   0xd   : > { %s2363_s13 = smov (!%p161_p3, %s1896_s13), 1  ;;  %vm1402_vm10 = vcmask 760832   ;;  %vm1655_vm11 = vcmask 695296   ;;  %vm1774_vm12 = vcmask 687104   ;;  %vm1839_vm13 = vcmask 195584  }
   0xe   : > { %s1990_s14 = smul.u32 24, %s2363_s13  ;;  %s1989_s8 = sshll.u32 %s2363_s13, 4 }
   0xf   : > { %s170_s11 = scalar_lea.vmem %s2361_s3, %s1989_s8 }
  0x10   : > { %s2077_s17 = scalar_lea.vmem %s2358_s0, %s1990_s14 }
  0x11   : > { %v2080_v7 = vld [vmem:[%s2077_s17] sm:$0x3f]  ;;  %v1905_v8 = vld [vmem:[%s2077_s17 + $0xc] sm:$0x3f]  ;;  %v2084_v9 = vld [vmem:[%s2077_s17 + $0x6] sm:$0x3f] }
  0x12   : > { %v2088_v10 = vrot.slane %v2080_v7, %v2072_v6  ;;  %v371_v11 = vrot.slane %v1905_v8, %v2072_v6  ;;  %v189_v12 = vrot.slane %v2084_v9, %v2072_v6  ;;  %v1458_v13 = vcombine.high %v1905_v8, %v1905_v8  ;;  %v1906_v24 = vld [vmem:[%s2077_s17 + $0x12] sm:$0x3f] }
  0x13   : > { %v434_v25 = vrot.slane %v1906_v24, %v2072_v6  ;;  %v1263_v27 = vcombine.high %v2080_v7, %v2080_v7  ;;  %v1331_v29 = vcombine.high %v2084_v9, %v2084_v9  ;;  %v1525_v31 = vcombine.high %v1906_v24, %v1906_v24  ;;  %v1930_v9 = vld [vmem:[%s2359_s1 + $0x20] sm:$0xf] }
  0x14   : > { %304 = vrot.lane.b32.xlu0 %v2088_v10, %s2027_s18  ;;  %v2096_v14 = vcombine.high %v2088_v10, %v2088_v10  ;;  %490 = vrot.lane.b32.xlu1 %v371_v11, %s2027_s18  ;;  %v2098_v15 = vcombine.high %v371_v11, %v371_v11  ;;  %v2100_v16 = vcombine.high %v189_v12, %v189_v12  ;;  %v197_v17 = vsel %vm195_vm0, %v189_v12, 0 }
  0x15   : > { %v2104_v18 = vrot.slane %v1458_v13, %v2072_v6  ;;  %v256_v19 = vsel %vm195_vm0, %v2088_v10, 0  ;;  %v377_v22 = vsel %vm195_vm0, %v371_v11, 0  ;;  %v435_v26 = vcombine.high %v434_v25, %v434_v25 }
  0x16   : > { %1908 = vmatprep.subr.msk.bf16.mxu0 %vm195_vm0, %v2100_v16  ;;  %1910 = vmatprep.subr.msk.bf16.mxu1 %vm195_vm0, %v2096_v14  ;;  %v1270_v28 = vrot.slane %v1263_v27, %v2072_v6  ;;  %v1338_v30 = vrot.slane %v1331_v29, %v2072_v6  ;;  %v1532_v32 = vrot.slane %v1525_v31, %v2072_v6  ;;  %v440_v44 = vsel %vm195_vm0, %v434_v25, 0  ;;  %v1942_v29 = vld [vmem:[%s2359_s1 + $0x30] sm:$0xf] }
  0x17   : > { %203 = vmatpush1.bf16.msra.mxu0 %v197_v17  ;;  %262 = vmatpush1.bf16.msra.mxu1 %v256_v19  ;;  %v1936_v19 = vld [vmem:[%s2359_s1 + $0x28] sm:$0xf] }
  0x18   : > { %306 = vrot.lane.b32.xlu0 %v2096_v14, %s2027_s18  ;;  %492 = vrot.lane.b32.xlu1 %v2098_v15, %s2027_s18 }
  0x19   : > { %1916 = vmatprep.subr.msk.bf16.mxu1 %vm195_vm0, %v2098_v15 }
  0x1a   : > { %1909 = vmatmul.mubr.msk.bf16.vlgmr.msra.gmra.mrb[0].mxu0 %vm191_vm1, %v1907_v20  ;;  %1911 = vmatmul.mubr.msk.bf16.vlgmr.msra.gmra.mrb[0].mxu1 %vm191_vm1, %v179_v21  ;;  %v1945_v20 = vld [vmem:[%s2359_s1 + $0x34] sm:$0xf] }
  0x1b   : > { %351 = vmatprep.mubr.bf16.mxu0 %v2026_v3  ;;  %383 = vmatpush1.bf16.msra.mxu1 %v377_v22 }
  0x1c   : > { %551 = vrot.lane.b32.xlu1 %v2096_v14, %s2028_s23  ;;  %549 = vrot.lane.b32.xlu0 %v2088_v10, %s2028_s23 }
  0x1d   : > { %414 = vmatprep.mubr.bf16.mxu1 %v2026_v3 }
  0x20   : > { %611 = vrot.lane.b32.xlu1 %v2100_v16, %s2028_s23  ;;  %609 = vrot.lane.b32.xlu0 %v189_v12, %s2028_s23 }
  0x22   : > { %1917 = vmatmul.mubr.msk.bf16.vlgmr.msra.gmra.mrb[4].mxu1 %vm191_vm1, %v1915_v23 }
  0x23   : > { %536 = vmatprep.mubr.bf16.mxu1 %v2026_v3 }
  0x24   : > { %670 = vrot.lane.b32.xlu1 %v2096_v14, %s2029_s26  ;;  %668 = vrot.lane.b32.xlu0 %v2088_v10, %s2029_s26 }
  0x28   : > { %730 = vrot.lane.b32.xlu1 %v2096_v14, %s2030_s27  ;;  %728 = vrot.lane.b32.xlu0 %v2088_v10, %s2030_s27 }
  0x2c   : > { %790 = vrot.lane.b32.xlu1 %v2100_v16, %s2030_s27  ;;  %788 = vrot.lane.b32.xlu0 %v189_v12, %s2030_s27 }
  0x30   : > { %849 = vrot.lane.b32.xlu1 %v2096_v14, %s2031_s28  ;;  %847 = vrot.lane.b32.xlu0 %v2088_v10, %s2031_s28 }
  0x34   : > { %909 = vrot.lane.b32.xlu1 %v2098_v15, %s2030_s27  ;;  %907 = vrot.lane.b32.xlu0 %v371_v11, %s2030_s27 }
  0x38   : > { %968 = vrot.lane.b32.xlu1 %v435_v26, %s2030_s27  ;;  %966 = vrot.lane.b32.xlu0 %v434_v25, %s2030_s27 }
  0x3c   : > { %1027 = vrot.lane.b32.xlu1 %v2098_v15, %s2031_s28  ;;  %1025 = vrot.lane.b32.xlu0 %v371_v11, %s2031_s28 }
  0x40   : > { %1086 = vrot.lane.b32.xlu1 %v2096_v14, %s2032_s29  ;;  %1084 = vrot.lane.b32.xlu0 %v2088_v10, %s2032_s29 }
  0x44   : > { %1146 = vrot.lane.b32.xlu1 %v2100_v16, %s2032_s29  ;;  %1144 = vrot.lane.b32.xlu0 %v189_v12, %s2032_s29 }
  0x48   : > { %1205 = vrot.lane.b32.xlu1 %v2096_v14, %s2033_s30  ;;  %1203 = vrot.lane.b32.xlu0 %v2088_v10, %s2033_s30  ;;  %v1939_v10 = vld [vmem:[%s2359_s1 + $0x2c] sm:$0xf] }
  0x4c   : > { %1273 = vrot.lane.b32.xlu1 %v1270_v28, %s2034_s4  ;;  %1271 = vrot.lane.b32.xlu0 %v2096_v14, %s2034_s4 }
  0x50   : > { %1341 = vrot.lane.b32.xlu1 %v1338_v30, %s2034_s4  ;;  %1339 = vrot.lane.b32.xlu0 %v2100_v16, %s2034_s4 }
  0x54   : > { %1400 = vrot.lane.b32.xlu1 %v1270_v28, %s2035_s5  ;;  %1398 = vrot.lane.b32.xlu0 %v2096_v14, %s2035_s5 }
  0x58   : > { %1468 = vrot.lane.b32.xlu1 %v2104_v18, %s2034_s4  ;;  %1466 = vrot.lane.b32.xlu0 %v2098_v15, %s2034_s4 }
  0x5c   : > { %1535 = vrot.lane.b32.xlu1 %v1532_v32, %s2034_s4  ;;  %1533 = vrot.lane.b32.xlu0 %v435_v26, %s2034_s4 }
  0x60   : > { %1594 = vrot.lane.b32.xlu1 %v2104_v18, %s2035_s5  ;;  %1592 = vrot.lane.b32.xlu0 %v2098_v15, %s2035_s5 }
  0x64   : > { %1653 = vrot.lane.b32.xlu1 %v1270_v28, %s2036_s6  ;;  %1651 = vrot.lane.b32.xlu0 %v2096_v14, %s2036_s6 }
  0x68   : > { %1713 = vrot.lane.b32.xlu1 %v1338_v30, %s2036_s6  ;;  %1711 = vrot.lane.b32.xlu0 %v2100_v16, %s2036_s6  ;;  %v1951_v30 = vld [vmem:[%s2359_s1 + $0x3c] sm:$0xf] }
  0x6c   : > { %1772 = vrot.lane.b32.xlu1 %v1270_v28, %s2037_s7  ;;  %1770 = vrot.lane.b32.xlu0 %v2096_v14, %s2037_s7 }
  0x70   : > { %1831 = vperm.xlu0 %2012, %v1828_v33  }
  0x86   : > { %v305_v34 = vpop.permute.xlu0 %304  ;;  %v491_v35 = vpop.permute.xlu1 %490 }
  0x8a   : > { %v307_v36 = vpop.permute.xlu0 %306  ;;  %v493_v37 = vpop.permute.xlu1 %492 }
  0x8b   : > { %v309_v38 = vsel %vm308_vm2, %v305_v34, %v307_v36  ;;  %1913 = vmatprep.subr.msk.bf16.mxu0 %vm195_vm0, %v307_v36  ;;  %v494_v39 = vsel %vm308_vm2, %v491_v35, %v493_v37  ;;  %1922 = vmatprep.subr.msk.bf16.mxu1 %vm195_vm0, %v493_v37 }
  0x8c   : > { %v314_v40 = vsel %vm195_vm0, %v309_v38, 0  ;;  %v499_v41 = vsel %vm195_vm0, %v494_v39, 0  ;;  %v1948_v39 = vld [vmem:[%s2359_s1 + $0x38] sm:$0xf] }
  0x8d   : > { %320 = vmatpush1.bf16.msra.mxu0 %v314_v40  ;;  %505 = vmatpush1.bf16.msra.mxu1 %v499_v41  ;;  %v1957_v40 = vld [vmem:[%s2359_s1 + $0x44] sm:$0xf] }
  0x8e   : > { %1919 = vmatprep.subr.msk.bf16.mxu0 %vm195_vm0, %v435_v26  ;;  %v552_v45 = vpop.permute.xlu1 %551  ;;  %v550_v46 = vpop.permute.xlu0 %549 }
  0x8f   : > { %v554_v49 = vsel %vm553_vm3, %v550_v46, %v552_v45 }
  0x90   : > { %1914 = vmatmul.mubr.msk.bf16.vlgmr.msra.gmra.mrb[4].mxu0 %vm191_vm1, %v1912_v42  ;;  %1923 = vmatmul.mubr.msk.bf16.vlgmr.msra.gmra.mrb[8].mxu1 %vm191_vm1, %v1921_v43  ;;  %v559_v54 = vsel %vm195_vm0, %v554_v49, 0  ;;  %v1954_v49 = vld [vmem:[%s2359_s1 + $0x40] sm:$0xf] }
  0x91   : > { %446 = vmatpush1.bf16.msra.mxu0 %v440_v44  ;;  %477 = vmatprep.mubr.bf16.mxu0 %v2026_v3 }
  0x92   : > { %1925 = vmatprep.subr.msk.bf16.mxu0 %vm195_vm0, %v552_v45  ;;  %v612_v47 = vpop.permute.xlu1 %611  ;;  %v610_v48 = vpop.permute.xlu0 %609  ;;  %655 = vmatprep.mubr.bf16.mxu1 %v2026_v3 }
  0x93   : > { %v613_v50 = vsel %vm553_vm3, %v610_v48, %v612_v47  ;;  %1928 = vmatprep.subr.msk.bf16.mxu1 %vm195_vm0, %v612_v47 }
  0x94   : > { %v618_v51 = vsel %vm195_vm0, %v613_v50, 0  ;;  %v1963_v50 = vld [vmem:[%s2359_s1 + $0x4c] sm:$0xf] }
  0x95   : > { %624 = vmatpush1.bf16.msra.mxu1 %v618_v51 }
  0x96   : > { %v671_v55 = vpop.permute.xlu1 %670  ;;  %v669_v56 = vpop.permute.xlu0 %668 }
  0x97   : > { %v673_v59 = vsel %vm672_vm4, %v669_v56, %v671_v55 }
  0x98   : > { %1920 = vmatmul.mubr.msk.bf16.vlgmr.msra.gmra.mrb[8].mxu0 %vm191_vm1, %v1918_v52  ;;  %1929 = vmatmul.mubr.msk.bf16.vlgmr.msra.gmra.mrb[12].mxu1 %vm191_vm1, %v1927_v53  ;;  %v678_v0 = vsel %vm195_vm0, %v673_v59, 0  ;;  %v1960_v59 = vld [vmem:[%s2359_s1 + $0x48] sm:$0xf] }
  0x99   : > { %565 = vmatpush1.bf16.msra.mxu0 %v559_v54  ;;  %596 = vmatprep.mubr.bf16.mxu0 %v2026_v3 }
  0x9a   : > { %1931 = vmatprep.subr.msk.bf16.mxu0 %vm195_vm0, %v671_v55  ;;  %v731_v57 = vpop.permute.xlu1 %730  ;;  %v729_v58 = vpop.permute.xlu0 %728  ;;  %775 = vmatprep.mubr.bf16.mxu1 %v2026_v3 }
  0x9b   : > { %v733_v60 = vsel %vm732_vm5, %v729_v58, %v731_v57  ;;  %1934 = vmatprep.subr.msk.bf16.mxu1 %vm195_vm0, %v731_v57 }
  0x9c   : > { %v738_v61 = vsel %vm195_vm0, %v733_v60, 0  ;;  %v1969_v60 = vld [vmem:[%s2359_s1 + $0x54] sm:$0xf] }
  0x9d   : > { %744 = vmatpush1.bf16.msra.mxu1 %v738_v61 }
  0x9e   : > { %v791_v1 = vpop.permute.xlu1 %790  ;;  %v789_v2 = vpop.permute.xlu0 %788 }
  0x9f   : > { %v792_v6 = vsel %vm732_vm5, %v789_v2, %v791_v1 }
  0xa0   : > { %1926 = vmatmul.mubr.msk.bf16.vlgmr.msra.gmra.mrb[12].mxu0 %vm191_vm1, %v1924_v62  ;;  %1935 = vmatmul.mubr.msk.bf16.vlgmr.msra.gmra.mrb[16].mxu1 %vm191_vm1, %v1933_v63  ;;  %v797_v11 = vsel %vm195_vm0, %v792_v6, 0  ;;  %v1966_v6 = vld [vmem:[%s2359_s1 + $0x50] sm:$0xf] }
  0xa1   : > { %684 = vmatpush1.bf16.msra.mxu0 %v678_v0  ;;  %715 = vmatprep.mubr.bf16.mxu0 %v2026_v3 }
  0xa2   : > { %1937 = vmatprep.subr.msk.bf16.mxu0 %vm195_vm0, %v791_v1  ;;  %v850_v4 = vpop.permute.xlu1 %849  ;;  %v848_v5 = vpop.permute.xlu0 %847  ;;  %894 = vmatprep.mubr.bf16.mxu1 %v2026_v3 }
  0xa3   : > { %v852_v7 = vsel %vm851_vm6, %v848_v5, %v850_v4  ;;  %1940 = vmatprep.subr.msk.bf16.mxu1 %vm195_vm0, %v850_v4 }
  0xa4   : > { %v857_v8 = vsel %vm195_vm0, %v852_v7, 0  ;;  %v1975_v7 = vld [vmem:[%s2359_s1 + $0x5c] sm:$0xf] }
  0xa5   : > { %863 = vmatpush1.bf16.msra.mxu1 %v857_v8 }
  0xa6   : > { %v910_v12 = vpop.permute.xlu1 %909  ;;  %v908_v13 = vpop.permute.xlu0 %907 }
  0xa7   : > { %v911_v16 = vsel %vm732_vm5, %v908_v13, %v910_v12 }
  0xa8   : > { %1932 = vmatmul.mubr.msk.bf16.vlgmr.msra.gmra.mrb[16].mxu0 %vm191_vm1, %v1930_v9  ;;  %1941 = vmatmul.mubr.msk.bf16.vlgmr.msra.gmra.mrb[20].mxu1 %vm191_vm1, %v1939_v10  ;;  %v916_v21 = vsel %vm195_vm0, %v911_v16, 0  ;;  %v1972_v16 = vld [vmem:[%s2359_s1 + $0x58] sm:$0xf] }
  0xa9   : > { %803 = vmatpush1.bf16.msra.mxu0 %v797_v11  ;;  %834 = vmatprep.mubr.bf16.mxu0 %v2026_v3 }
  0xaa   : > { %1943 = vmatprep.subr.msk.bf16.mxu0 %vm195_vm0, %v910_v12  ;;  %v969_v14 = vpop.permute.xlu1 %968  ;;  %v967_v15 = vpop.permute.xlu0 %966  ;;  %1012 = vmatprep.mubr.bf16.mxu1 %v2026_v3 }
  0xab   : > { %v970_v17 = vsel %vm732_vm5, %v967_v15, %v969_v14  ;;  %1946 = vmatprep.subr.msk.bf16.mxu1 %vm195_vm0, %v969_v14 }
  0xac   : > { %v975_v18 = vsel %vm195_vm0, %v970_v17, 0  ;;  %v1981_v17 = vld [vmem:[%s2359_s1 + $0x64] sm:$0xf] }
  0xad   : > { %981 = vmatpush1.bf16.msra.mxu1 %v975_v18 }
  0xae   : > { %v1028_v22 = vpop.permute.xlu1 %1027  ;;  %v1026_v23 = vpop.permute.xlu0 %1025 }
  0xaf   : > { %v1029_v26 = vsel %vm851_vm6, %v1026_v23, %v1028_v22 }
  0xb0   : > { %1938 = vmatmul.mubr.msk.bf16.vlgmr.msra.gmra.mrb[20].mxu0 %vm191_vm1, %v1936_v19  ;;  %1947 = vmatmul.mubr.msk.bf16.vlgmr.msra.gmra.mrb[24].mxu1 %vm191_vm1, %v1945_v20  ;;  %v1034_v31 = vsel %vm195_vm0, %v1029_v26, 0 }
  0xb1   : > { %922 = vmatpush1.bf16.msra.mxu0 %v916_v21  ;;  %953 = vmatprep.mubr.bf16.mxu0 %v2026_v3 }
  0xb2   : > { %1949 = vmatprep.subr.msk.bf16.mxu0 %vm195_vm0, %v1028_v22  ;;  %v1087_v24 = vpop.permute.xlu1 %1086  ;;  %v1085_v25 = vpop.permute.xlu0 %1084  ;;  %1131 = vmatprep.mubr.bf16.mxu1 %v2026_v3  ;;  %v1978_v22 = vld [vmem:[%s2359_s1 + $0x60] sm:$0xf] }
  0xb3   : > { %v1089_v27 = vsel %vm1088_vm7, %v1085_v25, %v1087_v24  ;;  %1952 = vmatprep.subr.msk.bf16.mxu1 %vm195_vm0, %v1087_v24  ;;  %v1984_v24 = vld [vmem:[%s2359_s1 + $0x68] sm:$0xf] }
  0xb4   : > { %v1094_v28 = vsel %vm195_vm0, %v1089_v27, 0 }
  0xb5   : > { %1100 = vmatpush1.bf16.msra.mxu1 %v1094_v28 }
  0xb6   : > { %v1147_v32 = vpop.permute.xlu1 %1146  ;;  %v1145_v33 = vpop.permute.xlu0 %1144 }
  0xb7   : > { %v1148_v36 = vsel %vm1088_vm7, %v1145_v33, %v1147_v32 }
  0xb8   : > { %1944 = vmatmul.mubr.msk.bf16.vlgmr.msra.gmra.mrb[24].mxu0 %vm191_vm1, %v1942_v29  ;;  %1953 = vmatmul.mubr.msk.bf16.vlgmr.msra.gmra.mrb[28].mxu1 %vm191_vm1, %v1951_v30  ;;  %v1153_v41 = vsel %vm195_vm0, %v1148_v36, 0 }
  0xb9   : > { %1040 = vmatpush1.bf16.msra.mxu0 %v1034_v31  ;;  %1071 = vmatprep.mubr.bf16.mxu0 %v2026_v3 }
  0xba   : > { %1955 = vmatprep.subr.msk.bf16.mxu0 %vm195_vm0, %v1147_v32  ;;  %v1206_v34 = vpop.permute.xlu1 %1205  ;;  %v1204_v35 = vpop.permute.xlu0 %1203  ;;  %1250 = vmatprep.mubr.bf16.mxu1 %v2026_v3 }
  0xbb   : > { %v1208_v37 = vsel %vm1207_vm8, %v1204_v35, %v1206_v34  ;;  %1958 = vmatprep.subr.msk.bf16.mxu1 %vm195_vm0, %v1206_v34 }
  0xbc   : > { %v1213_v38 = vsel %vm195_vm0, %v1208_v37, 0 }
  0xbd   : > { %1219 = vmatpush1.bf16.msra.mxu1 %v1213_v38 }
  0xbe   : > { %v1274_v42 = vpop.permute.xlu1 %1273  ;;  %v1272_v43 = vpop.permute.xlu0 %1271 }
  0xbf   : > { %v1276_v46 = vsel %vm1275_vm9, %v1272_v43, %v1274_v42 }
  0xc0   : > { %1950 = vmatmul.mubr.msk.bf16.vlgmr.msra.gmra.mrb[28].mxu0 %vm191_vm1, %v1948_v39  ;;  %1959 = vmatmul.mubr.msk.bf16.vlgmr.msra.gmra.mrb[32].mxu1 %vm191_vm1, %v1957_v40  ;;  %v1281_v51 = vsel %vm195_vm0, %v1276_v46, 0 }
  0xc1   : > { %1159 = vmatpush1.bf16.msra.mxu0 %v1153_v41  ;;  %1190 = vmatprep.mubr.bf16.mxu0 %v2026_v3 }
  0xc2   : > { %1961 = vmatprep.subr.msk.bf16.mxu0 %vm195_vm0, %v1274_v42  ;;  %v1342_v44 = vpop.permute.xlu1 %1341  ;;  %v1340_v45 = vpop.permute.xlu0 %1339  ;;  %1385 = vmatprep.mubr.bf16.mxu1 %v2026_v3 }
  0xc3   : > { %v1343_v47 = vsel %vm1275_vm9, %v1340_v45, %v1342_v44  ;;  %1964 = vmatprep.subr.msk.bf16.mxu1 %vm195_vm0, %v1342_v44 }
  0xc4   : > { %v1348_v48 = vsel %vm195_vm0, %v1343_v47, 0 }
  0xc5   : > { %1354 = vmatpush1.bf16.msra.mxu1 %v1348_v48 }
  0xc6   : > { %v1401_v52 = vpop.permute.xlu1 %1400  ;;  %v1399_v53 = vpop.permute.xlu0 %1398 }
  0xc7   : > { %v1403_v56 = vsel %vm1402_vm10, %v1399_v53, %v1401_v52 }
  0xc8   : > { %1956 = vmatmul.mubr.msk.bf16.vlgmr.msra.gmra.mrb[32].mxu0 %vm191_vm1, %v1954_v49  ;;  %1965 = vmatmul.mubr.msk.bf16.vlgmr.msra.gmra.mrb[36].mxu1 %vm191_vm1, %v1963_v50  ;;  %v1408_v61 = vsel %vm195_vm0, %v1403_v56, 0 }
  0xc9   : > { %1287 = vmatpush1.bf16.msra.mxu0 %v1281_v51  ;;  %1318 = vmatprep.mubr.bf16.mxu0 %v2026_v3 }
  0xca   : > { %1967 = vmatprep.subr.msk.bf16.mxu0 %vm195_vm0, %v1401_v52  ;;  %v1469_v54 = vpop.permute.xlu1 %1468  ;;  %v1467_v55 = vpop.permute.xlu0 %1466  ;;  %1512 = vmatprep.mubr.bf16.mxu1 %v2026_v3 }
  0xcb   : > { %v1470_v57 = vsel %vm1275_vm9, %v1467_v55, %v1469_v54  ;;  %1970 = vmatprep.subr.msk.bf16.mxu1 %vm195_vm0, %v1469_v54 }
  0xcc   : > { %v1475_v58 = vsel %vm195_vm0, %v1470_v57, 0 }
  0xcd   : > { %1481 = vmatpush1.bf16.msra.mxu1 %v1475_v58 }
  0xce   : > { %v1536_v62 = vpop.permute.xlu1 %1535  ;;  %v1534_v63 = vpop.permute.xlu0 %1533 }
  0xcf   : > { %v1537_v2 = vsel %vm1275_vm9, %v1534_v63, %v1536_v62 }
  0xd0   : > { %1962 = vmatmul.mubr.msk.bf16.vlgmr.msra.gmra.mrb[36].mxu0 %vm191_vm1, %v1960_v59  ;;  %1971 = vmatmul.mubr.msk.bf16.vlgmr.msra.gmra.mrb[40].mxu1 %vm191_vm1, %v1969_v60  ;;  %v1542_v8 = vsel %vm195_vm0, %v1537_v2, 0 }
  0xd1   : > { %1414 = vmatpush1.bf16.msra.mxu0 %v1408_v61  ;;  %1445 = vmatprep.mubr.bf16.mxu0 %v2026_v3 }
  0xd2   : > { %1973 = vmatprep.subr.msk.bf16.mxu0 %vm195_vm0, %v1536_v62  ;;  %v1595_v0 = vpop.permute.xlu1 %1594  ;;  %v1593_v1 = vpop.permute.xlu0 %1592  ;;  %1638 = vmatprep.mubr.bf16.mxu1 %v2026_v3 }
  0xd3   : > { %v1596_v4 = vsel %vm1402_vm10, %v1593_v1, %v1595_v0  ;;  %1976 = vmatprep.subr.msk.bf16.mxu1 %vm195_vm0, %v1595_v0 }
  0xd4   : > { %v1601_v5 = vsel %vm195_vm0, %v1596_v4, 0 }
  0xd5   : > { %1607 = vmatpush1.bf16.msra.mxu1 %v1601_v5 }
  0xd6   : > { %v1654_v9 = vpop.permute.xlu1 %1653  ;;  %v1652_v10 = vpop.permute.xlu0 %1651 }
  0xd7   : > { %v1656_v13 = vsel %vm1655_vm11, %v1652_v10, %v1654_v9 }
  0xd8   : > { %1968 = vmatmul.mubr.msk.bf16.vlgmr.msra.gmra.mrb[40].mxu0 %vm191_vm1, %v1966_v6  ;;  %1977 = vmatmul.mubr.msk.bf16.vlgmr.msra.gmra.mrb[44].mxu1 %vm191_vm1, %v1975_v7  ;;  %v1661_v18 = vsel %vm195_vm0, %v1656_v13, 0 }
  0xd9   : > { %1548 = vmatpush1.bf16.msra.mxu0 %v1542_v8  ;;  %1579 = vmatprep.mubr.bf16.mxu0 %v2026_v3 }
  0xda   : > { %1979 = vmatprep.subr.msk.bf16.mxu0 %vm195_vm0, %v1654_v9  ;;  %v1714_v11 = vpop.permute.xlu1 %1713  ;;  %v1712_v12 = vpop.permute.xlu0 %1711  ;;  %1757 = vmatprep.mubr.bf16.mxu1 %v2026_v3 }
  0xdb   : > { %v1715_v14 = vsel %vm1655_vm11, %v1712_v12, %v1714_v11  ;;  %1982 = vmatprep.subr.msk.bf16.mxu1 %vm195_vm0, %v1714_v11 }
  0xdc   : > { %v1720_v15 = vsel %vm195_vm0, %v1715_v14, 0 }
  0xdd   : > { %1726 = vmatpush1.bf16.msra.mxu1 %v1720_v15 }
  0xde   : > { %v1773_v19 = vpop.permute.xlu1 %1772  ;;  %v1771_v20 = vpop.permute.xlu0 %1770 }
  0xdf   : > { %v1775_v21 = vsel %vm1774_vm12, %v1771_v20, %v1773_v19 }
  0xe0   : > { %1974 = vmatmul.mubr.msk.bf16.vlgmr.msra.gmra.mrb[44].mxu0 %vm191_vm1, %v1972_v16  ;;  %1983 = vmatmul.mubr.msk.bf16.vlgmr.msra.gmra.mrb[48].mxu1 %vm191_vm1, %v1981_v17  ;;  %v1780_v23 = vsel %vm195_vm0, %v1775_v21, 0 }
  0xe1   : > { %1667 = vmatpush1.bf16.msra.mxu0 %v1661_v18  ;;  %1698 = vmatprep.mubr.bf16.mxu0 %v2026_v3 }
  0xe2   : > { %1985 = vmatprep.subr.msk.bf16.mxu0 %vm195_vm0, %v1773_v19 }
  0xe8   : > { %1980 = vmatmul.mubr.msk.bf16.vlgmr.msra.gmra.mrb[48].mxu0 %vm191_vm1, %v1978_v22 }
  0xe9   : > { %1786 = vmatpush1.bf16.msra.mxu0 %v1780_v23  ;;  %1817 = vmatprep.mubr.bf16.mxu0 %v2026_v3 }
  0xed   : > { %v236_v25 = vpop.f32.mrb[0].mxu0  ;;  %v295_v26 = vpop.f32.mrb[0].mxu1 }
  0xee   : > { %v238_v27 = vpop.f32.mrb[1].mxu0  ;;  %v296_v28 = vadd.f32 %v295_v26, %v236_v25  ;;  %v297_v29 = vpop.f32.mrb[1].mxu1 }
  0xef   : > { %v240_v30 = vpop.f32.mrb[2].mxu0  ;;  %v298_v31 = vadd.f32 %v297_v29, %v238_v27  ;;  %v299_v32 = vpop.f32.mrb[2].mxu1 }
  0xf0   : > { %1986 = vmatmul.mubr.msk.bf16.vlgmr.msra.gmra.mrb[52].mxu0 %vm191_vm1, %v1984_v24  ;;  %v241_v33 = vpop.f32.mrb[3].mxu0  ;;  %v300_v34 = vpop.f32.mrb[3].mxu1 }
  0xf5   : > { %v416_v35 = vpop.f32.mrb[4].mxu1 }
  0xf6   : > { %v418_v36 = vpop.f32.mrb[5].mxu1 }
  0xf7   : > { %v420_v37 = vpop.f32.mrb[6].mxu1 }
  0xf8   : > { %v421_v3 = vpop.f32.mrb[7].mxu1 }
 0x163   : > { %v353_v38 = vpop.f32.mrb[4].mxu0  ;;  %v538_v39 = vpop.f32.mrb[8].mxu1 }
 0x164   : > { %v360_v40 = vadd.f32 %v353_v38, %v296_v28  ;;  %v355_v41 = vpop.f32.mrb[5].mxu0  ;;  %v540_v42 = vpop.f32.mrb[9].mxu1 }
 0x165   : > { %v361_v43 = vadd.f32 %v355_v41, %v298_v31  ;;  %v357_v44 = vpop.f32.mrb[6].mxu0  ;;  %v542_v45 = vpop.f32.mrb[10].mxu1 }
 0x166   : > { %v423_v46 = vadd.f32 %v416_v35, %v360_v40  ;;  %v358_v47 = vpop.f32.mrb[7].mxu0  ;;  %v543_v48 = vpop.f32.mrb[11].mxu1 }
 0x167   : > { %v424_v49 = vadd.f32 %v418_v36, %v361_v43 }
 0x16b   : > { %v479_v50 = vpop.f32.mrb[8].mxu0  ;;  %v657_v51 = vpop.f32.mrb[12].mxu1 }
 0x16c   : > { %v486_v52 = vadd.f32 %v479_v50, %v423_v46  ;;  %v481_v53 = vpop.f32.mrb[9].mxu0  ;;  %v659_v54 = vpop.f32.mrb[13].mxu1 }
 0x16d   : > { %v487_v55 = vadd.f32 %v481_v53, %v424_v49  ;;  %v483_v56 = vpop.f32.mrb[10].mxu0  ;;  %v661_v57 = vpop.f32.mrb[14].mxu1 }
 0x16e   : > { %v545_v58 = vadd.f32 %v538_v39, %v486_v52  ;;  %v484_v59 = vpop.f32.mrb[11].mxu0  ;;  %v662_v60 = vpop.f32.mrb[15].mxu1 }
 0x16f   : > { %v546_v61 = vadd.f32 %v540_v42, %v487_v55 }
 0x173   : > { %v598_v62 = vpop.f32.mrb[12].mxu0  ;;  %v777_v63 = vpop.f32.mrb[16].mxu1 }
 0x174   : > { %v605_v0 = vadd.f32 %v598_v62, %v545_v58  ;;  %v600_v1 = vpop.f32.mrb[13].mxu0  ;;  %v779_v2 = vpop.f32.mrb[17].mxu1 }
 0x175   : > { %v606_v4 = vadd.f32 %v600_v1, %v546_v61  ;;  %v602_v5 = vpop.f32.mrb[14].mxu0  ;;  %v781_v6 = vpop.f32.mrb[18].mxu1 }
 0x176   : > { %v664_v7 = vadd.f32 %v657_v51, %v605_v0  ;;  %v603_v8 = vpop.f32.mrb[15].mxu0  ;;  %v782_v9 = vpop.f32.mrb[19].mxu1 }
 0x177   : > { %v665_v10 = vadd.f32 %v659_v54, %v606_v4 }
 0x17b   : > { %v717_v11 = vpop.f32.mrb[16].mxu0  ;;  %v896_v12 = vpop.f32.mrb[20].mxu1 }
 0x17c   : > { %v724_v13 = vadd.f32 %v717_v11, %v664_v7  ;;  %v719_v14 = vpop.f32.mrb[17].mxu0  ;;  %v898_v15 = vpop.f32.mrb[21].mxu1 }
 0x17d   : > { %v725_v16 = vadd.f32 %v719_v14, %v665_v10  ;;  %v721_v17 = vpop.f32.mrb[18].mxu0  ;;  %v900_v18 = vpop.f32.mrb[22].mxu1 }
 0x17e   : > { %v784_v19 = vadd.f32 %v777_v63, %v724_v13  ;;  %v722_v20 = vpop.f32.mrb[19].mxu0  ;;  %v901_v21 = vpop.f32.mrb[23].mxu1 }
 0x17f   : > { %v785_v22 = vadd.f32 %v779_v2, %v725_v16 }
 0x183   : > { %v836_v23 = vpop.f32.mrb[20].mxu0  ;;  %v1014_v24 = vpop.f32.mrb[24].mxu1 }
 0x184   : > { %v843_v25 = vadd.f32 %v836_v23, %v784_v19  ;;  %v838_v26 = vpop.f32.mrb[21].mxu0  ;;  %v1016_v27 = vpop.f32.mrb[25].mxu1 }
 0x185   : > { %v844_v28 = vadd.f32 %v838_v26, %v785_v22  ;;  %v840_v29 = vpop.f32.mrb[22].mxu0  ;;  %v1018_v30 = vpop.f32.mrb[26].mxu1 }
 0x186   : > { %v903_v31 = vadd.f32 %v896_v12, %v843_v25  ;;  %v841_v32 = vpop.f32.mrb[23].mxu0  ;;  %v1019_v33 = vpop.f32.mrb[27].mxu1 }
 0x187   : > { %v904_v34 = vadd.f32 %v898_v15, %v844_v28 }
 0x18b   : > { %v955_v35 = vpop.f32.mrb[24].mxu0  ;;  %v1133_v36 = vpop.f32.mrb[28].mxu1 }
 0x18c   : > { %v962_v37 = vadd.f32 %v955_v35, %v903_v31  ;;  %v957_v3 = vpop.f32.mrb[25].mxu0  ;;  %v1135_v38 = vpop.f32.mrb[29].mxu1 }
 0x18d   : > { %v963_v39 = vadd.f32 %v957_v3, %v904_v34  ;;  %v959_v40 = vpop.f32.mrb[26].mxu0  ;;  %v1137_v41 = vpop.f32.mrb[30].mxu1 }
 0x18e   : > { %v1021_v42 = vadd.f32 %v1014_v24, %v962_v37  ;;  %v960_v43 = vpop.f32.mrb[27].mxu0  ;;  %v1138_v44 = vpop.f32.mrb[31].mxu1 }
 0x18f   : > { %v1022_v45 = vadd.f32 %v1016_v27, %v963_v39 }
 0x193   : > { %v1073_v46 = vpop.f32.mrb[28].mxu0  ;;  %v1252_v47 = vpop.f32.mrb[32].mxu1 }
 0x194   : > { %v1080_v48 = vadd.f32 %v1073_v46, %v1021_v42  ;;  %v1075_v49 = vpop.f32.mrb[29].mxu0  ;;  %v1254_v50 = vpop.f32.mrb[33].mxu1 }
 0x195   : > { %v1081_v51 = vadd.f32 %v1075_v49, %v1022_v45  ;;  %v1077_v52 = vpop.f32.mrb[30].mxu0  ;;  %v1256_v53 = vpop.f32.mrb[34].mxu1 }
 0x196   : > { %v1140_v54 = vadd.f32 %v1133_v36, %v1080_v48  ;;  %v1078_v55 = vpop.f32.mrb[31].mxu0  ;;  %v1257_v56 = vpop.f32.mrb[35].mxu1 }
 0x197   : > { %v1141_v57 = vadd.f32 %v1135_v38, %v1081_v51  ;;  %v1832_v51 = vpop.permute.xlu0 %1831 }
 0x19b   : > { %v1192_v58 = vpop.f32.mrb[32].mxu0  ;;  %v1387_v59 = vpop.f32.mrb[36].mxu1 }
 0x19c   : > { %v1199_v60 = vadd.f32 %v1192_v58, %v1140_v54  ;;  %v1194_v61 = vpop.f32.mrb[33].mxu0  ;;  %v1389_v62 = vpop.f32.mrb[37].mxu1 }
 0x19d   : > { %v1200_v63 = vadd.f32 %v1194_v61, %v1141_v57  ;;  %v1196_v0 = vpop.f32.mrb[34].mxu0  ;;  %v1391_v1 = vpop.f32.mrb[38].mxu1 }
 0x19e   : > { %v1259_v2 = vadd.f32 %v1252_v47, %v1199_v60  ;;  %v1197_v4 = vpop.f32.mrb[35].mxu0  ;;  %v1392_v5 = vpop.f32.mrb[39].mxu1 }
 0x19f   : > { %v1260_v6 = vadd.f32 %v1254_v50, %v1200_v63 }
 0x1a3   : > { %v1320_v7 = vpop.f32.mrb[36].mxu0  ;;  %v1514_v8 = vpop.f32.mrb[40].mxu1 }
 0x1a4   : > { %v1327_v9 = vadd.f32 %v1320_v7, %v1259_v2  ;;  %v1322_v10 = vpop.f32.mrb[37].mxu0  ;;  %v1516_v11 = vpop.f32.mrb[41].mxu1 }
 0x1a5   : > { %v1328_v12 = vadd.f32 %v1322_v10, %v1260_v6  ;;  %v1324_v13 = vpop.f32.mrb[38].mxu0  ;;  %v1518_v14 = vpop.f32.mrb[42].mxu1 }
 0x1a6   : > { %v1394_v15 = vadd.f32 %v1387_v59, %v1327_v9  ;;  %v1325_v16 = vpop.f32.mrb[39].mxu0  ;;  %v1519_v17 = vpop.f32.mrb[43].mxu1 }
 0x1a7   : > { %v1395_v18 = vadd.f32 %v1389_v62, %v1328_v12 }
 0x1ab   : > { %v1447_v19 = vpop.f32.mrb[40].mxu0  ;;  %v1640_v20 = vpop.f32.mrb[44].mxu1 }
 0x1ac   : > { %v1454_v21 = vadd.f32 %v1447_v19, %v1394_v15  ;;  %v1449_v22 = vpop.f32.mrb[41].mxu0  ;;  %v1642_v23 = vpop.f32.mrb[45].mxu1 }
 0x1ad   : > { %v1455_v24 = vadd.f32 %v1449_v22, %v1395_v18  ;;  %v1451_v25 = vpop.f32.mrb[42].mxu0  ;;  %v1644_v26 = vpop.f32.mrb[46].mxu1 }
 0x1ae   : > { %v1521_v27 = vadd.f32 %v1514_v8, %v1454_v21  ;;  %v1452_v28 = vpop.f32.mrb[43].mxu0  ;;  %v1645_v29 = vpop.f32.mrb[47].mxu1 }
 0x1af   : > { %v1522_v30 = vadd.f32 %v1516_v11, %v1455_v24 }
 0x1b3   : > { %v1581_v31 = vpop.f32.mrb[44].mxu0  ;;  %v1759_v32 = vpop.f32.mrb[48].mxu1 }
 0x1b4   : > { %v1588_v33 = vadd.f32 %v1581_v31, %v1521_v27  ;;  %v1583_v34 = vpop.f32.mrb[45].mxu0  ;;  %v1761_v35 = vpop.f32.mrb[49].mxu1 }
 0x1b5   : > { %v1589_v36 = vadd.f32 %v1583_v34, %v1522_v30  ;;  %v1585_v37 = vpop.f32.mrb[46].mxu0  ;;  %v1763_v3 = vpop.f32.mrb[50].mxu1 }
 0x1b6   : > { %v1647_v38 = vadd.f32 %v1640_v20, %v1588_v33  ;;  %v1586_v39 = vpop.f32.mrb[47].mxu0  ;;  %v1764_v40 = vpop.f32.mrb[51].mxu1 }
 0x1b7   : > { %v1648_v41 = vadd.f32 %v1642_v23, %v1589_v36 }
 0x1bb   : > { %v1700_v42 = vpop.f32.mrb[48].mxu0 }
 0x1bc   : > { %v1707_v43 = vadd.f32 %v1700_v42, %v1647_v38  ;;  %v1702_v44 = vpop.f32.mrb[49].mxu0 }
 0x1bd   : > { %v1708_v45 = vadd.f32 %v1702_v44, %v1648_v41  ;;  %v1704_v46 = vpop.f32.mrb[50].mxu0 }
 0x1be   : > { %v1766_v47 = vadd.f32 %v1759_v32, %v1707_v43  ;;  %v1705_v48 = vpop.f32.mrb[51].mxu0 }
 0x1bf   : > { %v1767_v49 = vadd.f32 %v1761_v35, %v1708_v45 }
 0x1c3   : > { %v1819_v50 = vpop.f32.mrb[52].mxu0 }
 0x1c4   : > { %v1826_v52 = vadd.f32 %v1819_v50, %v1766_v47  ;;  %v1821_v53 = vpop.f32.mrb[53].mxu0 }
 0x1c5   : > { %v1827_v54 = vadd.f32 %v1821_v53, %v1767_v49  ;;  %v1823_v55 = vpop.f32.mrb[54].mxu0 }
 0x1c6   : > { %v1834_v56 = vadd.f32 %v1832_v51, %v1826_v52  ;;  %v1824_v57 = vpop.f32.mrb[55].mxu0 }
 0x1c7   : > { %v1835_v58 = vadd.f32 %v1832_v51, %v1827_v54 }
 0x1c8   : > { %v1836_v59 = vmax.f32 %v1834_v56, 0.0 }
 0x1c9   : > { %v1837_v60 = vmax.f32 %v1835_v58, 0.0 }
 0x1ca   : > { %1838 = vst [vmem:[%s170_s11] sm:$0xff] %v1836_v59 }
 0x1cb   : > { %1840 = vst.msk [vmem:[%s170_s11 + $0x8] sm:$0xff] %vm1839_vm13, %v1837_v60 }
 0x1cc PF: > { %s13_s12 = sadd.s32 1, %s2023_s12  }
 0x1cd   : > { %p10_p4 = scmp.ge.s32.totalorder %s13_s12, 4  }
 0x1cf   :  { %12 = sbr.rel (!%p10_p4) target bundleno = 1 (0x1), region = 91 }

</bundles_post_ra>
